<compile_context>
chip_gen: v5e
topology: v5e:2x2
jax: 0.10.0
libtpu: 0.0.40
codegen_flags: <defaults>
</compile_context>

<pallas_src>
import jax
import jax.numpy as jnp
from jax.experimental import pallas as pl
from jax.experimental.pallas import tpu as pltpu

BN_EPS = 1e-5


def predictor_kappa_kernel(xT_ref, w1_ref, gamma_ref, beta_ref, w2_ref, b2_ref,
                           o_ref):
    xT = xT_ref[...]                                         # (D, B) f32

    # fc1 on the MXU: (H, D) @ (D, B) -> (H, B).  fc1's bias is omitted: it is
    # cancelled exactly by BatchNorm's batch-mean subtraction below.
    h = jnp.dot(w1_ref[...], xT, preferred_element_type=jnp.float32)

    # BatchNorm1d (training mode, biased variance) fused into one scale/shift.
    # Single pass over h: sum and sum-of-squares along the batch (lane) axis.
    inv_b = 1.0 / h.shape[-1]                                # static
    s1 = jnp.sum(h, axis=-1, keepdims=True)                  # (H, 1)
    s2 = jnp.sum(h * h, axis=-1, keepdims=True)              # (H, 1)
    mean = s1 * inv_b
    var = s2 * inv_b - mean * mean
    scale = gamma_ref[...] * jax.lax.rsqrt(var + BN_EPS)     # (H, 1)
    shift = beta_ref[...] - mean * scale                     # (H, 1)

    # BN + ReLU: two elementwise ops per element.
    r = jnp.maximum(h * scale + shift, 0.0)                  # (H, B)

    # fc2 on VPU + reduce: out[b] = sum_h r[h, b] * w2[h] + b2  -> (1, B).
    y = jnp.sum(r * w2_ref[...], axis=0, keepdims=True) + b2_ref[0]
    o_ref[...] = y                                           # lane-dense store


def predictor_kappa(x, w1, b1, gamma, beta, w2, b2):
    """PredictorKappa forward (train-mode BatchNorm) as one Pallas call.

    x:     (B, D) float32
    w1:    (H, D) float32   -- fc1.weight (PyTorch layout)
    b1:    (H,)   float32   -- fc1.bias; mathematically cancelled by BN, unused
    gamma: (H,)   float32   -- bn1.weight
    beta:  (H,)   float32   -- bn1.bias
    w2:    (1, H) float32   -- fc2.weight (PyTorch layout)
    b2:    (1,)   float32   -- fc2.bias
    returns (B, 1) float32
    """
    del b1  # exactly cancelled by BatchNorm's batch-mean subtraction
    B, D = x.shape
    H = w1.shape[0]

    # Layout plumbing (outside the kernel): batch on lanes, per-feature params
    # as (H, 1) sublane vectors, scalar bias in SMEM.
    xT = jnp.asarray(x, jnp.float32).T                       # (D, B)
    w1_c = jnp.asarray(w1, jnp.float32)                      # (H, D)
    gamma_c = jnp.asarray(gamma, jnp.float32).reshape(H, 1)
    beta_c = jnp.asarray(beta, jnp.float32).reshape(H, 1)
    w2_c = jnp.asarray(w2, jnp.float32).reshape(H, 1)
    b2_c = jnp.asarray(b2, jnp.float32).reshape(1)

    vmem = pltpu.MemorySpace.VMEM
    smem = pltpu.MemorySpace.SMEM
    out_1B = pl.pallas_call(
        predictor_kappa_kernel,
        out_shape=jax.ShapeDtypeStruct((1, B), jnp.float32),
        in_specs=[
            pl.BlockSpec(memory_space=vmem),   # xT     (D, B)
            pl.BlockSpec(memory_space=vmem),   # w1     (H, D)
            pl.BlockSpec(memory_space=vmem),   # gamma  (H, 1)
            pl.BlockSpec(memory_space=vmem),   # beta   (H, 1)
            pl.BlockSpec(memory_space=vmem),   # w2     (H, 1)
            pl.BlockSpec(memory_space=smem),   # b2     (1,) scalar
        ],
        out_specs=pl.BlockSpec(memory_space=vmem),
    )(xT, w1_c, gamma_c, beta_c, w2_c, b2_c)

    return out_1B.reshape(B, 1)


def reference(x, w1, b1, gamma, beta, w2, b2):
    h = x @ w1.T + b1                                        # (B, H)
    mean = h.mean(0, keepdims=True)
    var = ((h - mean) ** 2).mean(0, keepdims=True)
    h = (h - mean) / jnp.sqrt(var + BN_EPS) * gamma + beta
    r = jnp.maximum(h, 0.0)
    return r @ w2.T + b2                                     # (B, 1)


if __name__ == "__main__":
    latent_dim = 32            # -> hidden = latent_dim // 4 = 8
    hidden = latent_dim // 4
    batch = 8

    key = jax.random.PRNGKey(0)
    kx, k1, kb1, k2, kb2 = jax.random.split(key, 5)

    x = jax.random.normal(kx, (batch, latent_dim), dtype=jnp.float32)

    # Deterministic parameter init (PyTorch-like uniform fan-in scaling),
    # in PyTorch weight layouts: fc1.weight (H, D), fc2.weight (1, H).
    lim1 = 1.0 / jnp.sqrt(latent_dim)
    w1 = jax.random.uniform(k1, (hidden, latent_dim), jnp.float32, -lim1, lim1)
    b1 = jax.random.uniform(kb1, (hidden,), jnp.float32, -lim1, lim1)
    lim2 = 1.0 / jnp.sqrt(hidden)
    w2 = jax.random.uniform(k2, (1, hidden), jnp.float32, -lim2, lim2)
    b2 = jax.random.uniform(kb2, (1,), jnp.float32, -lim2, lim2)
    gamma = jnp.ones((hidden,), jnp.float32)   # BatchNorm1d weight init
    beta = jnp.zeros((hidden,), jnp.float32)   # BatchNorm1d bias init

    out = predictor_kappa(x, w1, b1, gamma, beta, w2, b2)
    jax.block_until_ready(out)

    ref = reference(x, w1, b1, gamma, beta, w2, b2)
    assert out.shape == (batch, 1)
    assert jnp.allclose(out, ref, atol=1e-4, rtol=1e-4)

    print("KERNEL_OK")
</pallas_src>

<mosaic_0001>
module attributes {stable_mosaic.version = 11 : i64} {
  func.func @predictor_kappa_kernel(%arg0: memref<32x8xf32, #tpu.memory_space<vmem>>, %arg1: memref<8x32xf32, #tpu.memory_space<vmem>>, %arg2: memref<8x1xf32, #tpu.memory_space<vmem>>, %arg3: memref<8x1xf32, #tpu.memory_space<vmem>>, %arg4: memref<8x1xf32, #tpu.memory_space<vmem>>, %arg5: memref<1xf32, #tpu.memory_space<smem>>, %arg6: memref<1x8xf32, #tpu.memory_space<vmem>>) attributes {dimension_semantics = [], scalar_prefetch = 0 : i64, scratch_operands = 0 : i64, tpu.core_type = #tpu.core_type<tc>} {
    %c0 = arith.constant 0 : index
    %c0_0 = arith.constant 0 : index
    %0 = vector.load %arg0[%c0, %c0_0] : memref<32x8xf32, #tpu.memory_space<vmem>>, vector<32x8xf32>
    %c0_1 = arith.constant 0 : index
    %c0_2 = arith.constant 0 : index
    %1 = vector.load %arg1[%c0_1, %c0_2] : memref<8x32xf32, #tpu.memory_space<vmem>>, vector<8x32xf32>
    %cst = arith.constant dense<0.000000e+00> : vector<8x8xf32>
    %2 = tpu.matmul %1, %0, %cst {dimension_numbers = #tpu.dot_dimension_numbers<[1], [0], [0], [1], [0, 0, 1, 1], [], []>} : vector<8x32xf32>, vector<32x8xf32>, vector<8x8xf32> -> vector<8x8xf32>
    %cst_3 = arith.constant dense<0.000000e+00> : vector<8xf32>
    %3 = vector.multi_reduction <add>, %2, %cst_3 [1] : vector<8x8xf32> to vector<8xf32>
    %4 = vector.shape_cast %3 : vector<8xf32> to vector<8x1xf32>
    %5 = arith.mulf %2, %2 : vector<8x8xf32>
    %cst_4 = arith.constant dense<0.000000e+00> : vector<8xf32>
    %6 = vector.multi_reduction <add>, %5, %cst_4 [1] : vector<8x8xf32> to vector<8xf32>
    %7 = vector.shape_cast %6 : vector<8xf32> to vector<8x1xf32>
    %cst_5 = arith.constant 1.250000e-01 : f32
    %8 = vector.broadcast %cst_5 : f32 to vector<8x1xf32>
    %9 = arith.mulf %4, %8 : vector<8x1xf32>
    %cst_6 = arith.constant 1.250000e-01 : f32
    %10 = vector.broadcast %cst_6 : f32 to vector<8x1xf32>
    %11 = arith.mulf %7, %10 : vector<8x1xf32>
    %12 = arith.mulf %9, %9 : vector<8x1xf32>
    %13 = arith.subf %11, %12 : vector<8x1xf32>
    %c0_7 = arith.constant 0 : index
    %c0_8 = arith.constant 0 : index
    %14 = vector.load %arg2[%c0_7, %c0_8] : memref<8x1xf32, #tpu.memory_space<vmem>>, vector<8x1xf32>
    %cst_9 = arith.constant 9.99999974E-6 : f32
    %15 = vector.broadcast %cst_9 : f32 to vector<8x1xf32>
    %16 = arith.addf %13, %15 : vector<8x1xf32>
    %17 = math.rsqrt %16 : vector<8x1xf32>
    %18 = arith.mulf %14, %17 : vector<8x1xf32>
    %c0_10 = arith.constant 0 : index
    %c0_11 = arith.constant 0 : index
    %19 = vector.load %arg3[%c0_10, %c0_11] : memref<8x1xf32, #tpu.memory_space<vmem>>, vector<8x1xf32>
    %20 = arith.mulf %9, %18 : vector<8x1xf32>
    %21 = arith.subf %19, %20 : vector<8x1xf32>
    %22 = vector.broadcast %18 : vector<8x1xf32> to vector<8x8xf32>
    %23 = arith.mulf %2, %22 : vector<8x8xf32>
    %24 = vector.broadcast %21 : vector<8x1xf32> to vector<8x8xf32>
    %25 = arith.addf %23, %24 : vector<8x8xf32>
    %cst_12 = arith.constant 0.000000e+00 : f32
    %26 = vector.broadcast %cst_12 : f32 to vector<8x8xf32>
    %27 = arith.maximumf %25, %26 : vector<8x8xf32>
    %c0_13 = arith.constant 0 : index
    %c0_14 = arith.constant 0 : index
    %28 = vector.load %arg4[%c0_13, %c0_14] : memref<8x1xf32, #tpu.memory_space<vmem>>, vector<8x1xf32>
    %29 = vector.broadcast %28 : vector<8x1xf32> to vector<8x8xf32>
    %30 = arith.mulf %27, %29 : vector<8x8xf32>
    %cst_15 = arith.constant dense<0.000000e+00> : vector<8xf32>
    %31 = vector.multi_reduction <add>, %30, %cst_15 [0] : vector<8x8xf32> to vector<8xf32>
    %32 = vector.shape_cast %31 : vector<8xf32> to vector<1x8xf32>
    %c0_16 = arith.constant 0 : index
    %33 = memref.load %arg5[%c0_16] : memref<1xf32, #tpu.memory_space<smem>>
    %34 = vector.broadcast %33 : f32 to vector<1x8xf32>
    %35 = arith.addf %32, %34 : vector<1x8xf32>
    %c0_17 = arith.constant 0 : index
    %c0_18 = arith.constant 0 : index
    %36 = vector.load %arg6[%c0_17, %c0_18] : memref<1x8xf32, #tpu.memory_space<vmem>>, vector<1x8xf32>
    tpu.vector_store %arg6[%c0_17, %c0_18], %35 {strides = array<i32>} : memref<1x8xf32, #tpu.memory_space<vmem>>, vector<1x8xf32>,
    return
  }
}

</mosaic_0001>

<bundles_post_ra>
// kernel: tpu_custom_call.1
= control target key start
LH: loop header
LB: loop body
LE: loop exit
PB: predicated region body
PF: predicated region fallthrough
CT: control target
= control target key end

     0   :  { %s234_s0 = inlined_call_operand.vmem [shape: f32[32,8], index: 0, kind: input, shape index: {}]   ;;  %s235_s1 = inlined_call_operand.vmem [shape: f32[8,32], index: 1, kind: input, shape index: {}]   ;;  %s236_s2 = inlined_call_operand.vmem [shape: f32[8,1], index: 2, kind: input, shape index: {}]   ;;  %s237_s3 = inlined_call_operand.vmem [shape: f32[8,1], index: 3, kind: input, shape index: {}]   ;;  %s238_s4 = inlined_call_operand.vmem [shape: f32[8,1], index: 4, kind: input, shape index: {}]   ;;  %s239_s5 = inlined_call_operand.<no memory space> [shape: f32[1], index: 5, kind: input, shape index: {}]   ;;  %s240_s6 = inlined_call_operand.hbm [shape: f32[1,8], index: 6, kind: output, shape index: {}]  }
   0x1   :  { %v28_v0 = vld [vmem:[%s234_s0 + $0x18] sm:$0xff]  ;;  %v27_v1 = vld [vmem:[%s234_s0 + $0x10] sm:$0xff] }
   0x2   :  { %46 = vmatpush.msra.mxu0 %v28_v0 }
   0x3   :  { %12 = vsyncpa [#allocation4], 0  ;;  %v26_v2 = vld [vmem:[%s234_s0 + $0x8] sm:$0xff]  ;;  %v25_v3 = vld [vmem:[%s234_s0] sm:$0xff]  ;;  %vm30_vm0 = vcmask 261120   ;;  %vm54_vm1 = vcmask 64512   ;;  %v110_v43 = vstv %s239_s5 }
   0x4   :  { %47 = vmatpush.msra.mxu0 %v27_v1  ;;  %v29_v4 = vld [vmem:[%s235_s1] sm:$0xff]  ;;  %v164_v9 = vmov 0   ;;  %s121_s14 = sshll.u32 %s240_s6, 4  ;;  %vm112_vm5 = vcmask 57344   ;;  %s122_s14 = int_to_ptr.hbm [resolvable:$true] %s121_s14 }
   0x5   :  { %133 = vset.pattern.permute.xlu1 %v164_v9  ;;  %134 = vset.pattern.permute.xlu2 %v164_v9  ;;  %v95_v16 = vld [vmem:[%s238_s4] sm:$0xff] }
   0x6   :  { %48 = vmatpush.msra.mxu0 %v26_v2  ;;  %135 = vset.pattern.permute.xlu0 %v164_v9  ;;  %v66_v23 = vld [vmem:[%s236_s2] sm:$0xff] }
   0x7   :  { %98 = vperm.xlu2 %134, %v95_v16   ;;  %v79_v28 = vld [vmem:[%s237_s3] sm:$0xff]  ;;  %s165_s3 = smov [#allocation3]  }
   0x8   :  { %49 = vmatpush.msra.mxu0 %v25_v3  ;;  %s119_s11 = sshll.u32 %s165_s3, 4  ;;  %s120_s11 = int_to_ptr.vmem [resolvable:$true] %s119_s11 }
   0x9   :  { %130 = vmatmul.msk.f32.vlgmr.msra.gmra.mxu0 %vm30_vm0, %v29_v4 }
  0x61   :  { %v99_v34 = vpop.permute.xlu2 %98 }
  0x86   :  { %v51_v5 = vpop.f32.mrf.mxu0 }
  0x87   :  { %v55_v6 = vsel %vm54_vm1, %v51_v5, 0.0  ;;  %v58_v7 = vmul.f32 %v51_v5, %v51_v5 }
  0x88   :  { %56 = vadd.xlane.f32.xlu0 %v55_v6 }
  0x89   :  { %v59_v8 = vsel %vm54_vm1, %v58_v7, 0.0 }
  0x90   :  { %60 = vadd.xlane.f32.xlu0 %v59_v8 }
  0xfb   :  { %v57_v10 = vpop.xlane.xlu0 %56 }
  0xfc   :  { %v62_v11 = vmul.f32 0.125, %v57_v10 }
  0xfe   :  { %v64_v13 = vmul.f32 %v62_v11, %v62_v11 }
 0x103   :  { %v61_v12 = vpop.xlane.xlu0 %60 }
 0x104   :  { %v63_v14 = vmul.f32 0.125, %v61_v12 }
 0x106   :  { %v65_v15 = vsub.f32 %v63_v14, %v64_v13 }
 0x108   :  { %v67_v17 = vadd.f32 1e-05, %v65_v15 }
 0x10a   :  { %136 = vrsqrt.f32 %v67_v17  ;;  %vm74_vm3 = vweird.f32 %v67_v17 }
 0x110   :  { %v137_v18 = vpop.eup %136 }
 0x111   :  { %v69_v19 = vmul.f32 %v137_v18, %v67_v17  ;;  %vm75_vm2 = vweird.f32 %v137_v18 }
 0x112   :  { %vm76_vm4 = vmor %vm74_vm3, %vm75_vm2 }
 0x113   :  { %v70_v20 = vmul.f32 %v137_v18, %v69_v19 }
 0x115   :  { %v71_v21 = vmul.f32 0.5, %v70_v20 }
 0x117   :  { %v72_v22 = vsub.f32 1.5, %v71_v21 }
 0x119   :  { %v73_v24 = vmul.f32 %v137_v18, %v72_v22 }
 0x11b   :  { %v77_v25 = vsel %vm76_vm4, %v137_v18, %v73_v24 }
 0x11c   :  { %v78_v26 = vmul.f32 %v77_v25, %v66_v23 }
 0x11e   :  { %84 = vperm.xlu1 %133, %v78_v26   ;;  %v80_v27 = vmul.f32 %v78_v26, %v62_v11 }
 0x120   :  { %v81_v29 = vsub.f32 %v79_v28, %v80_v27 }
 0x126   :  { %90 = vperm.xlu1 %133, %v81_v29  }
 0x190   :  { %v85_v30 = vpop.permute.xlu1 %84 }
 0x191   :  { %v87_v31 = vmul.f32 %v85_v30, %v51_v5 }
 0x198   :  { %v91_v32 = vpop.permute.xlu1 %90 }
 0x199   :  { %v93_v33 = vadd.f32 %v91_v32, %v87_v31 }
 0x19b   :  { %v94_v35 = vmax.f32 %v93_v33, 0.0 }
 0x19d   :  { %v101_v36 = vmul.f32 %v99_v34, %v94_v35 }
 0x19f   :  { %v102_v37 = vsel %vm54_vm1, %v101_v36, 0.0 }
 0x1a0   :  { %v103_v38 = vrot.slane %v102_v37, 4 }
 0x1a2   :  { %v104_v39 = vadd.f32 %v103_v38, %v102_v37 }
 0x1a4   :  { %v105_v40 = vrot.slane %v104_v39, 2 }
 0x1a6   :  { %v106_v41 = vadd.f32 %v105_v40, %v104_v39 }
 0x1a8   :  { %v107_v42 = vrot.slane %v106_v41, 1 }
 0x1aa   :  { %v108_v44 = vadd.f32 %v107_v42, %v106_v41 }
 0x1ac   :  { %v111_v45 = vadd.f32 %v110_v43, %v108_v44 }
 0x1ae   :  { %113 = vst.msk [vmem:[#allocation3] sm:$0x1] %vm112_vm5, %v111_v45 }
 0x1af   :  { %124 = dma.vmem_to_hbm [thread:$0]  %s120_s11, 16, %s122_s14, [#allocation4]  }
 0x1b0   :  { %162 = dma.done.wait [#allocation4], 16  }
 0x1b1   :  { %163 = vsyncadd [#allocation4], 4294967280 }
 0x1b2   :  { %129 = vsyncpa [#allocation4], 1 }

</bundles_post_ra>
